<compile_context>
chip_gen: v6e
topology: v6e:2x2x1
jax: 0.10.0
libtpu: 0.0.40
codegen_flags: <defaults>
</compile_context>

<pallas_src>
import jax
import jax.numpy as jnp
from jax.experimental import pallas as pl
from jax.experimental.pallas import tpu as pltpu

BN_EPS = 1e-5


# ----------------------------- Pallas kernel -----------------------------

def conv_unit_kernel(lhs_ref, w_ref, p_ref, gb_ref, o_ref):
    """Fused conv3x3(pad=1) + BatchNorm2d(batch stats) + ReLU.

    lhs_ref : (N*H, 3*W*Cin_p) bf16  im2col'd (dy-stacked) lane-dense input
    w_ref   : (3*W*Cin_p, W*Cout) bf16  dy-stacked banded conv weights
    p_ref   : (Cout, W*Cout) f32  0/1 selector: P[c, w*Cout + c] = 1
    gb_ref  : (2, Cout) f32  row0 = BN gamma, row1 = BN beta
    o_ref   : (N*H, W*Cout) f32  lane-dense output (w major, c minor)
    """
    NH, WCout = o_ref.shape
    Cout = gb_ref.shape[-1]
    W = WCout // Cout

    # ---- conv: ONE lane-dense bf16 matmul, f32 accumulation on the MXU ----
    acc = jnp.dot(lhs_ref[...], w_ref[...], preferred_element_type=jnp.float32)
    # NOTE: conv bias intentionally omitted -- training-mode BN subtracts the
    # batch mean, which cancels any per-channel bias exactly.

    # ---- BatchNorm2d training-mode stats, single pass (sum & sum of squares) ----
    cnt = jnp.float32(NH * W)                                # N*H*W elements per channel
    rsum = jnp.sum(acc, axis=0, keepdims=True)               # (1, W*Cout)
    rsq = jnp.sum(acc * acc, axis=0, keepdims=True)          # (1, W*Cout)
    stats = jnp.concatenate([rsum, rsq], axis=0)             # (2, W*Cout)

    # fold the W groups down to per-channel with ONE tiny matmul (M=2)
    dn = (((1,), (1,)), ((), ()))                            # contract lane dims
    stats_c = jax.lax.dot_general(stats, p_ref[...], dn,
                                  preferred_element_type=jnp.float32)  # (2, Cout)

    mean = stats_c[0:1, :] / cnt
    var = stats_c[1:2, :] / cnt - mean * mean                # biased batch variance
    var = jnp.maximum(var, 0.0)                              # guard one-pass cancellation
    gamma = gb_ref[0:1, :]
    beta = gb_ref[1:2, :]
    scale = gamma * jax.lax.rsqrt(var + BN_EPS)              # (1, Cout)
    shift = beta - mean * scale                              # (1, Cout)

    # broadcast per-channel scale/shift back to the lane layout with ONE matmul
    ss = jnp.concatenate([scale, shift], axis=0)             # (2, Cout)
    ss_l = jnp.dot(ss, p_ref[...], preferred_element_type=jnp.float32)  # (2, W*Cout)

    # ---- fused BN affine + ReLU: one FMA + max, stored lane-dense ----
    o_ref[...] = jnp.maximum(acc * ss_l[0:1, :] + ss_l[1:2, :], 0.0).astype(o_ref.dtype)


# ----------------------------- wrapper / glue -----------------------------

def build_banded_weights(w_hwio, W, cin_p):
    """Fold dx taps + W zero-padding into banded matrices, dy-stacked along K.

    w_hwio: (3, 3, Cin, Cout) -> (3*W*cin_p, W*Cout) with
      M[dy*W*cin_p + pw*cin_p + ci, qw*Cout + co] = w_hwio[dy, pw - qw + 1, ci, co]
      (zero when pw - qw + 1 is outside [0, 3), which implements pad=1 in W;
       rows for padded input channels ci >= Cin are zero).
    """
    KH, KW, Cin, Cout = w_hwio.shape
    wpad = jnp.pad(w_hwio, ((0, 0), (0, 0), (0, cin_p - Cin), (0, 0)))
    pw = jnp.arange(W)[:, None]                 # input w position
    qw = jnp.arange(W)[None, :]                 # output w position
    dx = pw - qw + 1                            # tap index
    valid = ((dx >= 0) & (dx < KW)).astype(wpad.dtype)[..., None, None]
    dx_c = jnp.clip(dx, 0, KW - 1)
    mats = []
    for dy in range(KH):
        sel = wpad[dy][dx_c] * valid            # (W, W, cin_p, Cout)
        mats.append(sel.transpose(0, 2, 1, 3).reshape(W * cin_p, W * Cout))
    return jnp.concatenate(mats, axis=0)        # (3*W*cin_p, W*Cout)


def build_selector(W, Cout):
    """0/1 selector P with P[c, w*Cout + c] = 1 (fold W groups <-> per-channel)."""
    lane_c = jnp.arange(W * Cout)[None, :] % Cout
    row_c = jnp.arange(Cout)[:, None]
    return (lane_c == row_c).astype(jnp.float32)            # (Cout, W*Cout)


def conv_unit(x_nchw, w_hwio, b, gamma, beta):
    """ConvUnit forward: (N, Cin, H, W) -> (N, Cout, H, W)."""
    N, Cin, H, W = x_nchw.shape
    Cout = w_hwio.shape[-1]
    del b  # conv bias is mathematically cancelled by training-mode BatchNorm

    # pad Cin to a multiple of 8 so each dy chunk is a full 128-lane width
    cin_p = ((Cin + 7) // 8) * 8

    # NCHW -> NHWC -> pad channels -> fold (W, Cin_p) into lanes; pad H only.
    x = jnp.transpose(x_nchw, (0, 2, 3, 1))
    x = jnp.pad(x, ((0, 0), (0, 0), (0, 0), (0, cin_p - Cin)))
    x = x.reshape(N, H, W * cin_p)
    xp = jnp.pad(x, ((0, 0), (1, 1), (0, 0)))

    # im2col over dy in the wrapper (no in-kernel sublane relayouts): K = 3*W*cin_p
    lhs = jnp.concatenate([xp[:, dy:dy + H, :] for dy in range(3)], axis=-1)
    lhs = lhs.reshape(N * H, 3 * W * cin_p).astype(jnp.bfloat16)

    wb = build_banded_weights(w_hwio, W, cin_p).astype(jnp.bfloat16)
    P = build_selector(W, Cout)                               # (Cout, W*Cout) f32
    gb = jnp.stack([gamma, beta]).astype(jnp.float32)         # (2, Cout)

    vmem = pl.BlockSpec(memory_space=pltpu.MemorySpace.VMEM)
    out2d = pl.pallas_call(
        conv_unit_kernel,
        out_shape=jax.ShapeDtypeStruct((N * H, W * Cout), jnp.float32),
        in_specs=[vmem, vmem, vmem, vmem],
        out_specs=vmem,
    )(lhs, wb, P, gb)

    # lane-dense (N*H, W*Cout) -> NCHW
    out = jnp.transpose(out2d.reshape(N, H, W, Cout), (0, 3, 1, 2))
    return out.astype(x_nchw.dtype)


# -------------------- parameter init (PyTorch-shaped defaults) --------------------

def init_conv_unit(key, cin, cout):
    kw, kb = jax.random.split(key)
    fan_in = cin * 9
    bound = 1.0 / jnp.sqrt(jnp.float32(fan_in))
    w_oihw = jax.random.uniform(kw, (cout, cin, 3, 3), jnp.float32, -bound, bound)
    w_hwio = jnp.transpose(w_oihw, (2, 3, 1, 0))           # -> (3, 3, Cin, Cout)
    b = jax.random.uniform(kb, (cout,), jnp.float32, -bound, bound)
    gamma = jnp.ones((cout,), jnp.float32)                 # BatchNorm2d default weight
    beta = jnp.zeros((cout,), jnp.float32)                 # BatchNorm2d default bias
    return (w_hwio, b, gamma, beta)


# -------------------- pure-JAX reference for correctness check --------------------

def conv_unit_ref(x_nchw, w_hwio, b, gamma, beta):
    x = jnp.transpose(x_nchw, (0, 2, 3, 1))
    y = jax.lax.conv_general_dilated(
        x, w_hwio, window_strides=(1, 1), padding="SAME",
        dimension_numbers=("NHWC", "HWIO", "NHWC")) + b
    mean = jnp.mean(y, axis=(0, 1, 2))
    var = jnp.mean((y - mean) ** 2, axis=(0, 1, 2))
    y = (y - mean) * gamma / jnp.sqrt(var + BN_EPS) + beta
    y = jnp.maximum(y, 0.0)
    return jnp.transpose(y, (0, 3, 1, 2))


if __name__ == "__main__":
    # batch=2, in_channels=4, out_channels=8, spatial 16x16 (NCHW input)
    N, CIN, COUT, H, W = 2, 4, 8, 16, 16

    root = jax.random.PRNGKey(0)
    kx, kp = jax.random.split(root)
    x = jax.random.normal(kx, (N, CIN, H, W), jnp.float32)
    w, b, gamma, beta = init_conv_unit(kp, CIN, COUT)

    out = jax.block_until_ready(conv_unit(x, w, b, gamma, beta))
    assert out.shape == (N, COUT, H, W), out.shape

    ref = jax.block_until_ready(conv_unit_ref(x, w, b, gamma, beta))
    err = float(jnp.max(jnp.abs(out - ref)))
    assert jnp.allclose(out, ref, atol=2e-2, rtol=2e-2), err

    print("KERNEL_OK")
</pallas_src>

<mosaic_0001>
module attributes {stable_mosaic.version = 11 : i64} {
  func.func @conv_unit_kernel(%arg0: memref<32x384xbf16, #tpu.memory_space<vmem>>, %arg1: memref<384x128xbf16, #tpu.memory_space<vmem>>, %arg2: memref<8x128xf32, #tpu.memory_space<vmem>>, %arg3: memref<2x8xf32, #tpu.memory_space<vmem>>, %arg4: memref<32x128xf32, #tpu.memory_space<vmem>>) attributes {dimension_semantics = [], scalar_prefetch = 0 : i64, scratch_operands = 0 : i64, tpu.core_type = #tpu.core_type<tc>} {
    %c0 = arith.constant 0 : index
    %c0_0 = arith.constant 0 : index
    %0 = vector.load %arg0[%c0, %c0_0] : memref<32x384xbf16, #tpu.memory_space<vmem>>, vector<32x384xbf16>
    %c0_1 = arith.constant 0 : index
    %c0_2 = arith.constant 0 : index
    %1 = vector.load %arg1[%c0_1, %c0_2] : memref<384x128xbf16, #tpu.memory_space<vmem>>, vector<384x128xbf16>
    %cst = arith.constant dense<0.000000e+00> : vector<32x128xf32>
    %2 = tpu.matmul %0, %1, %cst {dimension_numbers = #tpu.dot_dimension_numbers<[1], [0], [0], [1], [0, 0, 1, 1], [], []>} : vector<32x384xbf16>, vector<384x128xbf16>, vector<32x128xf32> -> vector<32x128xf32>
    %cst_3 = arith.constant dense<0.000000e+00> : vector<128xf32>
    %3 = vector.multi_reduction <add>, %2, %cst_3 [0] : vector<32x128xf32> to vector<128xf32>
    %4 = vector.shape_cast %3 : vector<128xf32> to vector<1x128xf32>
    %5 = arith.mulf %2, %2 : vector<32x128xf32>
    %cst_4 = arith.constant dense<0.000000e+00> : vector<128xf32>
    %6 = vector.multi_reduction <add>, %5, %cst_4 [0] : vector<32x128xf32> to vector<128xf32>
    %7 = vector.shape_cast %6 : vector<128xf32> to vector<1x128xf32>
    %8 = tpu.concatenate %4, %7 in 0 : vector<1x128xf32>, vector<1x128xf32> -> vector<2x128xf32>
    %c0_5 = arith.constant 0 : index
    %c0_6 = arith.constant 0 : index
    %9 = vector.load %arg2[%c0_5, %c0_6] : memref<8x128xf32, #tpu.memory_space<vmem>>, vector<8x128xf32>
    %cst_7 = arith.constant dense<0.000000e+00> : vector<2x8xf32>
    %10 = tpu.matmul %8, %9, %cst_7 {dimension_numbers = #tpu.dot_dimension_numbers<[1], [1], [0], [0], [0, 0, 1, 0], [], []>} : vector<2x128xf32>, vector<8x128xf32>, vector<2x8xf32> -> vector<2x8xf32>
    %11 = vector.extract_strided_slice %10 {offsets = [0, 0], sizes = [1, 8], strides = [1, 1]} : vector<2x8xf32> to vector<1x8xf32>
    %cst_8 = arith.constant 5.120000e+02 : f32
    %12 = vector.broadcast %cst_8 : f32 to vector<1x8xf32>
    %13 = arith.divf %11, %12 : vector<1x8xf32>
    %14 = vector.extract_strided_slice %10 {offsets = [1, 0], sizes = [1, 8], strides = [1, 1]} : vector<2x8xf32> to vector<1x8xf32>
    %cst_9 = arith.constant 5.120000e+02 : f32
    %15 = vector.broadcast %cst_9 : f32 to vector<1x8xf32>
    %16 = arith.divf %14, %15 : vector<1x8xf32>
    %17 = arith.mulf %13, %13 : vector<1x8xf32>
    %18 = arith.subf %16, %17 : vector<1x8xf32>
    %cst_10 = arith.constant 0.000000e+00 : f32
    %19 = vector.broadcast %cst_10 : f32 to vector<1x8xf32>
    %20 = arith.maximumf %18, %19 : vector<1x8xf32>
    %c0_11 = arith.constant 0 : index
    %c0_12 = arith.constant 0 : index
    %21 = vector.load %arg3[%c0_11, %c0_12] : memref<2x8xf32, #tpu.memory_space<vmem>>, vector<1x8xf32>
    %c1 = arith.constant 1 : index
    %c0_13 = arith.constant 0 : index
    %22 = vector.load %arg3[%c1, %c0_13] : memref<2x8xf32, #tpu.memory_space<vmem>>, vector<1x8xf32>
    %cst_14 = arith.constant 9.99999974E-6 : f32
    %23 = vector.broadcast %cst_14 : f32 to vector<1x8xf32>
    %24 = arith.addf %20, %23 : vector<1x8xf32>
    %25 = math.rsqrt %24 : vector<1x8xf32>
    %26 = arith.mulf %21, %25 : vector<1x8xf32>
    %27 = arith.mulf %13, %26 : vector<1x8xf32>
    %28 = arith.subf %22, %27 : vector<1x8xf32>
    %29 = tpu.concatenate %26, %28 in 0 : vector<1x8xf32>, vector<1x8xf32> -> vector<2x8xf32>
    %c0_15 = arith.constant 0 : index
    %c0_16 = arith.constant 0 : index
    %30 = vector.load %arg2[%c0_15, %c0_16] : memref<8x128xf32, #tpu.memory_space<vmem>>, vector<8x128xf32>
    %cst_17 = arith.constant dense<0.000000e+00> : vector<2x128xf32>
    %31 = tpu.matmul %29, %30, %cst_17 {dimension_numbers = #tpu.dot_dimension_numbers<[1], [0], [0], [1], [0, 0, 1, 1], [], []>} : vector<2x8xf32>, vector<8x128xf32>, vector<2x128xf32> -> vector<2x128xf32>
    %32 = vector.extract_strided_slice %31 {offsets = [0, 0], sizes = [1, 128], strides = [1, 1]} : vector<2x128xf32> to vector<1x128xf32>
    %33 = vector.broadcast %32 : vector<1x128xf32> to vector<32x128xf32>
    %34 = arith.mulf %2, %33 : vector<32x128xf32>
    %35 = vector.extract_strided_slice %31 {offsets = [1, 0], sizes = [1, 128], strides = [1, 1]} : vector<2x128xf32> to vector<1x128xf32>
    %36 = vector.broadcast %35 : vector<1x128xf32> to vector<32x128xf32>
    %37 = arith.addf %34, %36 : vector<32x128xf32>
    %cst_18 = arith.constant 0.000000e+00 : f32
    %38 = vector.broadcast %cst_18 : f32 to vector<32x128xf32>
    %39 = arith.maximumf %37, %38 : vector<32x128xf32>
    %c0_19 = arith.constant 0 : index
    %c0_20 = arith.constant 0 : index
    %40 = vector.load %arg4[%c0_19, %c0_20] : memref<32x128xf32, #tpu.memory_space<vmem>>, vector<32x128xf32>
    tpu.vector_store %arg4[%c0_19, %c0_20], %39 {strides = array<i32>} : memref<32x128xf32, #tpu.memory_space<vmem>>, vector<32x128xf32>,
    return
  }
}

</mosaic_0001>

<bundles_post_ra>
// kernel: tpu_custom_call.1
= control target key start
LH: loop header
LB: loop body
LE: loop exit
PB: predicated region body
PF: predicated region fallthrough
CT: control target
= control target key end

     0   :  { %9 = vsyncpa [#allocation3], 0  ;;  %s921_s0 = inlined_call_operand.hbm [shape: bf16[32,384], index: 0, kind: input, shape index: {}]   ;;  %s922_s1 = inlined_call_operand.hbm [shape: bf16[384,128], index: 1, kind: input, shape index: {}]   ;;  %s923_s2 = inlined_call_operand.hbm [shape: f32[8,128], index: 2, kind: input, shape index: {}]   ;;  %s924_s3 = inlined_call_operand.vmem [shape: f32[2,8], index: 3, kind: input, shape index: {}]   ;;  %s925_s4 = inlined_call_operand.hbm [shape: f32[32,128], index: 4, kind: output, shape index: {}]  }
   0x1   :  { %10 = vsyncpa [#allocation6], 0 }
   0x2   :  { %11 = vsyncpa [#allocation4], 0  ;;  %s856_s15 = smov [#allocation5]  }
   0x3   :  { %s29_s16 = sshll.u32 %s856_s15, 4  ;;  %s30_s16 = int_to_ptr.vmem [resolvable:$true] %s29_s16 }
   0x4   :  { %s778_s17 = scalar_lea.vmem %s30_s16, 3072  ;;  %p783_p1 = scmp.lt.s32.totalorder %s30_s16, %s30_s16 }
   0x5   :  { %p779_p0 = scmp.ne.s32.totalorder %s30_s16, %s778_s17  ;;  %p784_p2 = scmp.lt.s32.totalorder %s778_s17, %s778_s17 }
   0x7   :  { %p785_p3 = por %p784_p2, %p783_p1 }
   0x9   :  { %p786_p4 = pnand %p785_p3, %p779_p0 }
   0xb   :  { %789 = shalt.err (!%p786_p4)
}
   0xc   :  { %s857_s18 = smov 64   ;;  %s858_s19 = smov 4  }
   0xd   :  { %35 = dma.hbm_to_vmem [thread:$0]  %s922_s1, 3072, %s30_s16, [#allocation6], %s857_s18, %s857_s18, %s858_s19  }
   0xe   :  { %s859_s22 = smov [#allocation2]  }
   0xf   :  { %s17_s23 = sshll.u32 %s859_s22, 4  ;;  %s18_s23 = int_to_ptr.vmem [resolvable:$true] %s17_s23 }
  0x10   :  { %s798_s24 = scalar_lea.vmem %s18_s23, 768  ;;  %p803_p6 = scmp.lt.s32.totalorder %s18_s23, %s18_s23 }
  0x11   :  { %p799_p5 = scmp.ne.s32.totalorder %s18_s23, %s798_s24  ;;  %p804_p7 = scmp.lt.s32.totalorder %s798_s24, %s798_s24 }
  0x13   :  { %p805_p8 = por %p804_p7, %p803_p6 }
  0x15   :  { %p806_p9 = pnand %p805_p8, %p799_p5 }
  0x17   :  { %809 = shalt.err (!%p806_p9)
}
  0x18   :  { %s860_s25 = smov 192   ;;  %s861_s26 = smov 12  }
  0x19   :  { %23 = dma.hbm_to_vmem [thread:$0]  %s921_s0, 768, %s18_s23, [#allocation3], %s860_s25, %s860_s25, %s861_s26  }
  0x1a   :  { %s862_s29 = smov [#allocation7]  }
  0x1b   :  { %s42_s30 = sshll.u32 %s862_s29, 4  ;;  %s43_s30 = int_to_ptr.vmem [resolvable:$true] %s42_s30 }
  0x1c   :  { %s818_s1 = scalar_lea.vmem %s43_s30, 128  ;;  %p823_p11 = scmp.lt.s32.totalorder %s43_s30, %s43_s30 }
  0x1d   :  { %p819_p10 = scmp.ne.s32.totalorder %s43_s30, %s818_s1  ;;  %p824_p12 = scmp.lt.s32.totalorder %s818_s1, %s818_s1 }
  0x1f   :  { %p825_p13 = por %p824_p12, %p823_p11 }
  0x21   :  { %p826_p0 = pnand %p825_p13, %p819_p10 }
  0x23   :  { %829 = shalt.err (!%p826_p0)
}
  0x24   :  { %45 = dma.hbm_to_vmem [thread:$0]  %s923_s2, 128, %s43_s30, [#allocation6]  }
  0x25   :  { %850 = dma.done.wait [#allocation3], 768  }
  0x26   :  { %851 = vsyncadd [#allocation3], 4294966528 }
  0x27   :  { %852 = dma.done.wait [#allocation6], 3200  }
  0x28   :  { %853 = vsyncadd [#allocation6], 4294964096  ;;  %v736_v0 = vld [vmem:[#allocation5 + $0x78] sm:$0xff]   ;;  %v739_v3 = vld [vmem:[#allocation5 + $0x70] sm:$0xff]   ;;  %v863_v31 = vmov 0.0   ;;  %vm864_vm0 = vmmov 0  }
  0x29   :  { %v737_v1 = vld [vmem:[#allocation5 + $0xb8] sm:$0xff]   ;;  %652 = vmatprep.subr.bf16.mxu0 %v736_v0  ;;  %v740_v4 = vld [vmem:[#allocation5 + $0xb0] sm:$0xff]   ;;  %v742_v6 = vld [vmem:[#allocation5 + $0x68] sm:$0xff]   ;;  %vm410_vm1 = vcmask 1040384   ;;  %vm505_vm2 = vcmask 64512  }
  0x2a   :  { %v738_v2 = vld [vmem:[#allocation5 + $0x38] sm:$0xff]   ;;  %694 = vmatprep.subr.bf16.mxu1 %v737_v1  ;;  %v741_v5 = vld [vmem:[#allocation5 + $0x30] sm:$0xff]   ;;  %v743_v7 = vld [vmem:[#allocation5 + $0xa8] sm:$0xff]  }
  0x2b   :  { %653 = vmatpush3.bf16.msra.mxu0 %v738_v2  ;;  %695 = vmatpush3.bf16.msra.mxu1 %v737_v1  ;;  %v744_v8 = vld [vmem:[#allocation5 + $0x28] sm:$0xff]   ;;  %v745_v9 = vld [vmem:[#allocation5 + $0x60] sm:$0xff]   ;;  %v748_v12 = vld [vmem:[#allocation5 + $0x58] sm:$0xff]  }
  0x2c   :  { %654 = vmatprep.subr.bf16.mxu0 %v739_v3  ;;  %696 = vmatprep.subr.bf16.mxu1 %v740_v4  ;;  %v746_v10 = vld [vmem:[#allocation5 + $0xa0] sm:$0xff]   ;;  %v749_v13 = vld [vmem:[#allocation5 + $0x98] sm:$0xff]   ;;  %v751_v15 = vld [vmem:[#allocation5 + $0x50] sm:$0xff]  }
  0x2d   :  { %v747_v11 = vld [vmem:[#allocation5 + $0x20] sm:$0xff]   ;;  %v750_v14 = vld [vmem:[#allocation5 + $0x18] sm:$0xff]   ;;  %v752_v16 = vld [vmem:[#allocation5 + $0x90] sm:$0xff]  }
  0x2e   :  { %v753_v17 = vld [vmem:[#allocation5 + $0x10] sm:$0xff]   ;;  %v754_v18 = vld [vmem:[#allocation5 + $0x48] sm:$0xff]   ;;  %v757_v21 = vld [vmem:[#allocation5 + $0x40] sm:$0xff]  }
  0x2f   :  { %655 = vmatpush3.bf16.msra.mxu0 %v741_v5  ;;  %697 = vmatpush3.bf16.msra.mxu1 %v740_v4  ;;  %v755_v19 = vld [vmem:[#allocation5 + $0x88] sm:$0xff]   ;;  %v758_v22 = vld [vmem:[#allocation5 + $0x80] sm:$0xff]   ;;  %v760_v26 = vld [vmem:[#allocation2] ss:$12 sps:$4 sm:$0xff]  }
  0x30   :  { %656 = vmatprep.subr.bf16.mxu0 %v742_v6  ;;  %698 = vmatprep.subr.bf16.mxu1 %v743_v7  ;;  %v756_v20 = vld [vmem:[#allocation5 + $0x8] sm:$0xff]   ;;  %v762_v23 = vld [vmem:[#allocation2 + $0x4] ss:$12 sps:$4 sm:$0xff]   ;;  %v763_v24 = vld [vmem:[#allocation2 + $0x8] ss:$12 sps:$4 sm:$0xff]  }
  0x31   :  { %322 = vmatprep.mubr.bf16.mxu0 %v762_v23  ;;  %v759_v25 = vld [vmem:[#allocation5] sm:$0xff]   ;;  %710 = vmatprep.mubr.bf16.mxu1 %v763_v24  ;;  %v764_v27 = vld [vmem:[#allocation2 + $0x20] ss:$12 sps:$4 sm:$0xff]   ;;  %v765_v28 = vld [vmem:[#allocation2 + $0x1c] ss:$12 sps:$4 sm:$0xff]  }
  0x32   :  { %v767_v29 = vld [vmem:[#allocation2 + $0x18] ss:$12 sps:$4 sm:$0xff]   ;;  %v412_v30 = vld [vmem:[#allocation7] sm:$0xff]  ;;  %v492_v23 = vld [vmem:[%s924_s3 + $0x1] sm:$0x1] }
  0x33   :  { %657 = vmatpush3.bf16.msra.mxu0 %v744_v8  ;;  %699 = vmatpush3.bf16.msra.mxu1 %v743_v7 }
  0x34   :  { %658 = vmatprep.subr.bf16.mxu0 %v745_v9  ;;  %700 = vmatprep.subr.bf16.mxu1 %v746_v10 }
  0x37   :  { %659 = vmatpush3.bf16.msra.mxu0 %v747_v11  ;;  %701 = vmatpush3.bf16.msra.mxu1 %v746_v10 }
  0x38   :  { %660 = vmatprep.subr.bf16.mxu0 %v748_v12  ;;  %702 = vmatprep.subr.bf16.mxu1 %v749_v13 }
  0x3b   :  { %661 = vmatpush3.bf16.msra.mxu0 %v750_v14  ;;  %703 = vmatpush3.bf16.msra.mxu1 %v749_v13 }
  0x3c   :  { %662 = vmatprep.subr.bf16.mxu0 %v751_v15  ;;  %704 = vmatprep.subr.bf16.mxu1 %v752_v16 }
  0x3f   :  { %663 = vmatpush3.bf16.msra.mxu0 %v753_v17  ;;  %705 = vmatpush3.bf16.msra.mxu1 %v752_v16 }
  0x40   :  { %664 = vmatprep.subr.bf16.mxu0 %v754_v18  ;;  %706 = vmatprep.subr.bf16.mxu1 %v755_v19 }
  0x43   :  { %665 = vmatpush3.bf16.msra.mxu0 %v756_v20  ;;  %707 = vmatpush3.bf16.msra.mxu1 %v755_v19  ;;  %v491_v20 = vld [vmem:[%s924_s3] sm:$0x1]  ;;  %s865_s3 = smov [#allocation8]  }
  0x44   :  { %666 = vmatprep.subr.bf16.mxu0 %v757_v21  ;;  %708 = vmatprep.subr.bf16.mxu1 %v758_v22  ;;  %s608_s9 = sshll.u32 %s865_s3, 4  ;;  %s609_s9 = int_to_ptr.vmem [resolvable:$true] %s608_s9 }
  0x45   :  { %s830_s10 = scalar_lea.vmem %s609_s9, 512  ;;  %p835_p2 = scmp.lt.s32.totalorder %s609_s9, %s609_s9 }
  0x46   :  { %p831_p1 = scmp.ne.s32.totalorder %s609_s9, %s830_s10  ;;  %p836_p3 = scmp.lt.s32.totalorder %s830_s10, %s830_s10 }
  0x47   :  { %667 = vmatpush3.bf16.msra.mxu0 %v759_v25  ;;  %709 = vmatpush3.bf16.msra.mxu1 %v758_v22 }
  0x48   :  { %714 = vmatprep.subr.mxu1 %v863_v31  ;;  %p837_p4 = por %p836_p3, %p835_p2 }
  0x4a   :  { %323 = vmatmul.mubr.bf16.vlgmr.msra.gmra.mxu0 %v760_v26  ;;  %711 = vmatmul.mubr.bf16.vlgmr.msra.gmra.mxu1 %v764_v27  ;;  %p838_p5 = pnand %p837_p4, %p831_p1 }
  0x4b   :  { %330 = vmatprep.mubr.bf16.mxu0 %v765_v28  ;;  %716 = vmatprep.mubr.msk.f32.mxu1 %vm864_vm0, %v863_v31  ;;  %v579_v28 = vlaneseq }
  0x4c   :  { %715 = vmatpush3.xpose.msra.mxu1 %v412_v30 }
  0x4d   :  { %719 = vmatprep.subr.mxu1 %v863_v31 }
  0x52   :  { %331 = vmatmul.mubr.bf16.gmra.mxu0 %v767_v29  ;;  %v580_v29 = vshrl.u32 %v579_v28, 7 }
 0x10a   :  { %v668_v32 = vpop.f32.mrf.mxu0  ;;  %v712_v33 = vpop.f32.mrf.mxu1 }
 0x10c   :  { %v669_v34 = vpop.f32.mrf.mxu0  ;;  %v373_v35 = vpop.f32.mrf.mxu1 }
 0x10d   :  { %v670_v39 = vadd.f32 %v669_v34, %v668_v32 }
 0x10e   :  { %v671_v36 = vpop.f32.mrf.mxu0  ;;  %v713_v37 = vpop.f32.mrf.mxu1 }
 0x10f   :  { %v374_v45 = vadd.f32 %v670_v39, %v373_v35 }
 0x110   :  { %v672_v38 = vpop.f32.mrf.mxu0  ;;  %v376_v41 = vpop.f32.mrf.mxu1 }
 0x111   :  { %v673_v40 = vadd.f32 %v672_v38, %v671_v36  ;;  %v397_v51 = vmul.f32 %v374_v45, %v374_v45 }
 0x112   :  { %v674_v42 = vpop.f32.mrf.mxu0 }
 0x113   :  { %v903_v43 = vadd.f32 %v673_v40, %v376_v41 }
 0x114   :  { %v675_v44 = vpop.f32.mrf.mxu0 }
 0x115   :  { %v676_v46 = vadd.f32 %v675_v44, %v674_v42  ;;  %v398_v48 = vmul.f32 %v903_v43, %v903_v43  ;;  %v388_v52 = vadd.f32 %v903_v43, %v374_v45 }
 0x116   :  { %v677_v47 = vpop.f32.mrf.mxu0 }
 0x117   :  { %v382_v49 = vadd.f32 %v712_v33, %v676_v46  ;;  %v401_v55 = vadd.f32 %v398_v48, %v397_v51 }
 0x118   :  { %v678_v50 = vpop.f32.mrf.mxu0 }
 0x119   :  { %v399_v53 = vmul.f32 %v382_v49, %v382_v49  ;;  %v679_v54 = vadd.f32 %v678_v50, %v677_v47  ;;  %v389_v56 = vadd.f32 %v388_v52, %v382_v49 }
 0x11b   :  { %v385_v57 = vadd.f32 %v713_v37, %v679_v54  ;;  %v402_v58 = vadd.f32 %v401_v55, %v399_v53 }
 0x11d   :  { %v390_v59 = vadd.f32 %v389_v56, %v385_v57  ;;  %v400_v60 = vmul.f32 %v385_v57, %v385_v57 }
 0x11f   :  { %v391_v61 = vrot.slane %v390_v59, 4  ;;  %v403_v62 = vadd.f32 %v402_v58, %v400_v60 }
 0x121   :  { %v392_v63 = vadd.f32 %v391_v61, %v390_v59  ;;  %v404_v0 = vrot.slane %v403_v62, 4 }
 0x123   :  { %v393_v1 = vrot.slane %v392_v63, 2  ;;  %v405_v2 = vadd.f32 %v404_v0, %v403_v62 }
 0x125   :  { %v394_v3 = vadd.f32 %v393_v1, %v392_v63  ;;  %v406_v4 = vrot.slane %v405_v2, 2 }
 0x127   :  { %v395_v5 = vrot.slane %v394_v3, 1  ;;  %v407_v6 = vadd.f32 %v406_v4, %v405_v2 }
 0x129   :  { %v408_v7 = vrot.slane %v407_v6, 1  ;;  %v396_v8 = vadd.f32 %v395_v5, %v394_v3 }
 0x12b   :  { %v409_v9 = vadd.f32 %v408_v7, %v407_v6 }
 0x12d   :  { %v411_v10 = vsel %vm410_vm1, %v396_v8, %v409_v9 }
 0x12e   :  { %717 = vmatmul.mubr.f32.vlgmr.msra.gmra.mxu1 %v411_v10 }
 0x12f   :  { %720 = vmatpush3.msra.mxu1 %v412_v30  ;;  %721 = vmatprep.mubr.msk.f32.mxu1 %vm864_vm0, %v863_v31  ;;  %v581_v30 = vsub.s32 0, %v580_v29  ;;  %v589_v31 = vsub.s32 1, %v580_v29 }
 0x1ee   :  { %v479_v11 = vpop.f32.mrf.mxu1 }
 0x1ef   :  { %v484_v12 = vmul.f32 0.001953125, %v479_v11 }
 0x1f0   :  { %v718_v13 = vpop.f32.mrf.mxu1 }
 0x1f1   :  { %v485_v14 = vmul.f32 %v484_v12, %v484_v12 }
 0x1f3   :  { %v487_v15 = vrot.slane %v485_v14, 7 }
 0x1f5   :  { %v489_v16 = vsub.f32 %v484_v12, %v487_v15 }
 0x1f7   :  { %v490_v17 = vmax.f32 %v489_v16, 0.0 }
 0x1f9   :  { %v493_v18 = vadd.f32 1e-05, %v490_v17 }
 0x1fb   :  { %768 = vrsqrt.f32 %v493_v18 }
 0x208   :  { %v769_v19 = vpop.eup %768 }
 0x209   :  { %v496_v21 = vrot.slane %v769_v19, 1 }
 0x20b   :  { %v498_v22 = vmul.f32 %v496_v21, %v491_v20 }
 0x20d   :  { %v499_v24 = vmul.f32 %v498_v22, %v484_v12 }
 0x20f   :  { %v500_v25 = vsub.f32 %v492_v23, %v499_v24 }
 0x211   :  { %v502_v26 = vrot.slane %v500_v25, 7 }
 0x213   :  { %v504_v27 = vsel %vm410_vm1, %v498_v22, %v502_v26 }
 0x214   :  { %722 = vmatmul.mubr.msk.f32.vlgmr.msra.gmra.mxu1 %vm505_vm2, %v504_v27 }
 0x2d4   :  { %v575_v32 = vpop.f32.mrf.mxu1 }
 0x2d5   :  { %v582_v33 = vrot.slane %v575_v32, %v581_v30  ;;  %v590_v34 = vrot.slane %v575_v32, %v589_v31 }
 0x2d6   :  { %v723_v35 = vpop.f32.mrf.mxu1 }
 0x2d7   :  { %v583_v36 = vmul.f32 %v582_v33, %v374_v45  ;;  %v584_v37 = vmul.f32 %v582_v33, %v903_v43  ;;  %v585_v38 = vmul.f32 %v582_v33, %v382_v49  ;;  %v586_v39 = vmul.f32 %v582_v33, %v385_v57 }
 0x2d9   :  { %v591_v40 = vadd.f32 %v590_v34, %v583_v36  ;;  %v592_v41 = vadd.f32 %v590_v34, %v584_v37  ;;  %v593_v42 = vadd.f32 %v590_v34, %v585_v38  ;;  %v594_v44 = vadd.f32 %v590_v34, %v586_v39 }
 0x2db   :  { %v595_v46 = vmax.f32 %v591_v40, 0.0  ;;  %v596_v47 = vmax.f32 %v592_v41, 0.0  ;;  %v597_v48 = vmax.f32 %v593_v42, 0.0  ;;  %v598_v50 = vmax.f32 %v594_v44, 0.0 }
 0x2dd   :  { %599 = vst [vmem:[#allocation8] sm:$0xff] %v595_v46  ;;  %600 = vst [vmem:[#allocation8 + $0x8] sm:$0xff] %v596_v47 }
 0x2de   :  { %601 = vst [vmem:[#allocation8 + $0x10] sm:$0xff] %v597_v48  ;;  %602 = vst [vmem:[#allocation8 + $0x18] sm:$0xff] %v598_v50 }
 0x2df   :  { %841 = shalt.err (!%p838_p5)
}
 0x2e0   :  { %s866_s11 = smov 128   ;;  %s867_s12 = smov 8  }
 0x2e1   :  { %614 = dma.vmem_to_hbm [thread:$0]  %s609_s9, 512, %s925_s4, [#allocation4], %s866_s11, %s866_s11, %s867_s12  }
 0x2e2   :  { %854 = dma.done.wait [#allocation4], 512  }
 0x2e3   :  { %855 = vsyncadd [#allocation4], 4294966784 }
 0x2e4   :  { %618 = vsyncpa [#allocation3], 1 }
 0x2e5   :  { %619 = vsyncpa [#allocation6], 1 }
 0x2e6   :  { %620 = vsyncpa [#allocation4], 1 }

</bundles_post_ra>
